<compile_context>
chip_gen: v6e
topology: v6e:2x2x1
jax: 0.10.0
libtpu: 0.0.40
codegen_flags: <defaults>
</compile_context>

<pallas_src>
import math
from functools import partial

import jax
import jax.numpy as jnp
from jax.experimental import pallas as pl
from jax.experimental.pallas import tpu as pltpu


def _round_up(x: int, m: int) -> int:
    return int(pl.cdiv(x, m) * m)


def _embedding_gather_kernel(ids_ref, table_hbm, out_ref, rows_ref, sem,
                             *, tile_t, do_scale, inv_scale):
    # ids_ref:   SMEM (n_pad,) int32  -- all token ids (scalar-prefetched)
    # table_hbm: HBM  (V, D)          -- embedding table, never copied wholesale
    # out_ref:   VMEM (tile_t, D)     -- output tile for this grid step
    # rows_ref:  VMEM (tile_t, D)     -- gather landing buffer (scratch)
    # sem:       scalar DMA semaphore shared by all row copies of this tile
    base = pl.program_id(0) * tile_t

    # Phase 1: issue all tile_t row-gather DMAs; they overlap one another.
    @pl.loop(0, tile_t)
    def _issue(t):
        row = ids_ref[base + t]
        pltpu.make_async_copy(table_hbm.at[pl.ds(row, 1)],
                              rows_ref.at[pl.ds(t, 1)],
                              sem).start()

    # Phase 2: drain — one same-shape wait per issued copy on the shared sem.
    @pl.loop(0, tile_t)
    def _drain(t):
        pltpu.make_async_copy(table_hbm.at[pl.ds(0, 1)],
                              rows_ref.at[pl.ds(t, 1)],
                              sem).wait()

    vals = rows_ref[...]
    if do_scale:                      # trace-time branch; no mul when disabled
        vals = vals * inv_scale       # inv_scale is an inlined Python float
    out_ref[...] = vals.astype(out_ref.dtype)


def embedding_forward(ids: jax.Array, table: jax.Array,
                      do_scale: bool = True, tile_t: int = 256) -> jax.Array:
    """Embedding lookup + optional 1/sqrt(D) scaling as a Pallas TPU kernel.

    tile_t: tokens gathered per grid step. 256 is a good default; bump to
    512-1024 on v6e/v7x for large token counts (purely a perf knob).
    """
    B, S = ids.shape
    V, D = table.shape
    n_tok = B * S

    # Shrink the tile for tiny inputs so a single exact tile covers everything
    # (no padding, no post-kernel slice copy). Keep it a multiple of 8.
    tile_t = max(8, min(int(tile_t), _round_up(n_tok, 8)))
    n_pad = _round_up(n_tok, tile_t)

    ids_flat = ids.reshape(-1).astype(jnp.int32)
    if n_pad != n_tok:
        # Padded ids gather row 0 (always valid); padded rows are sliced off.
        ids_flat = jnp.pad(ids_flat, (0, n_pad - n_tok))

    inv_scale = (1.0 / math.sqrt(D)) if do_scale else 1.0

    kernel = partial(_embedding_gather_kernel, tile_t=tile_t,
                     do_scale=do_scale, inv_scale=inv_scale)

    out_padded = pl.pallas_call(
        kernel,
        out_shape=jax.ShapeDtypeStruct((n_pad, D), table.dtype),
        grid_spec=pltpu.PrefetchScalarGridSpec(
            num_scalar_prefetch=1,                 # ids -> SMEM, visible to maps
            grid=(n_pad // tile_t,),
            in_specs=[
                # Full table stays in HBM; rows are gathered by manual DMA.
                pl.BlockSpec(memory_space=pl.ANY),
            ],
            out_specs=pl.BlockSpec((tile_t, D), lambda i, ids: (i, 0)),
            scratch_shapes=[
                pltpu.VMEM((tile_t, D), table.dtype),   # gather landing buffer
                pltpu.SemaphoreType.DMA(()),            # shared row-copy sem
            ],
        ),
        compiler_params=pltpu.CompilerParams(
            dimension_semantics=("parallel",),
        ),
    )(ids_flat, table)

    out = out_padded if n_pad == n_tok else out_padded[:n_tok]
    return out.reshape(B, S, D)


def init_embedding_table(key, num_embeddings: int, embedding_dim: int,
                         padding_idx: int) -> jax.Array:
    # nn.Embedding default init: N(0, 1), with the padding_idx row zeroed.
    w = jax.random.normal(key, (num_embeddings, embedding_dim), dtype=jnp.float32)
    w = w.at[padding_idx].set(0.0)
    return w


if __name__ == "__main__":
    # Small, deterministic config consistent with the module's forward pass.
    # D=128 keeps the output block lane-dense (see perf notes above).
    num_embeddings = 128
    embedding_dim = 128
    padding_idx = 0
    B, S = 2, 8

    key = jax.random.PRNGKey(0)
    k_tab, k_ids = jax.random.split(key)

    table = init_embedding_table(k_tab, num_embeddings, embedding_dim, padding_idx)
    ids = jax.random.randint(k_ids, (B, S), minval=0, maxval=num_embeddings,
                             dtype=jnp.int32)
    # Ensure the padding index appears at least once (it maps to a zero row).
    ids = ids.at[0, 0].set(padding_idx)

    # Scaled path (the module's default).
    out = embedding_forward(ids, table, do_scale=True)
    out = jax.block_until_ready(out)
    ref = table[ids] / math.sqrt(embedding_dim)
    assert out.shape == (B, S, embedding_dim), out.shape
    assert jnp.allclose(out, ref, atol=1e-5, rtol=1e-5), "mismatch vs reference"

    # Unscaled path: pure gather, must match exactly.
    out_ns = embedding_forward(ids, table, do_scale=False)
    out_ns = jax.block_until_ready(out_ns)
    assert jnp.array_equal(out_ns, table[ids]), "mismatch vs reference (no scale)"

    print("KERNEL_OK")
</pallas_src>

<mosaic_0001>
module attributes {stable_mosaic.version = 11 : i64} {
  func.func @_embedding_gather_kernel(%arg0: i32, %arg1: memref<16xi32, #tpu.memory_space<smem>>, %arg2: memref<128x128xf32, #tpu.memory_space<any>>, %arg3: memref<16x128xf32, #tpu.memory_space<vmem>>, %arg4: memref<16x128xf32, #tpu.memory_space<vmem>>, %arg5: memref<!tpu.dma_semaphore, #tpu.memory_space<semaphore_mem>>) attributes {dimension_semantics = [#tpu.dimension_semantics<parallel>], iteration_bounds = array<i64: 1>, scalar_prefetch = 1 : i64, scratch_operands = 2 : i64, tpu.core_type = #tpu.core_type<tc>, window_params = [{}, {transform_indices = @transform_1, window_bounds = array<i64: 16, 128>}]} {
    %c16_i32 = arith.constant 16 : i32
    %0 = arith.muli %arg0, %c16_i32 : i32
    %c0_i32 = arith.constant 0 : i32
    %c16_i32_0 = arith.constant 16 : i32
    %1 = arith.addi %c0_i32, %c16_i32_0 : i32
    %c1_i32 = arith.constant 1 : i32
    scf.for %arg6 = %c0_i32 to %1 step %c1_i32  : i32 {
      %c1_i32_9 = arith.constant 1 : i32
      %7 = arith.muli %arg6, %c1_i32_9 : i32
      %c0_i32_10 = arith.constant 0 : i32
      %8 = arith.addi %c0_i32_10, %7 : i32
      %9 = arith.addi %0, %8 : i32
      %10 = arith.index_cast %9 : i32 to index
      %11 = memref.load %arg1[%10] : memref<16xi32, #tpu.memory_space<smem>>
      %c0_i32_11 = arith.constant 0 : i32
      %12 = tpu.memref_slice %arg2[%11, %c0_i32_11] : memref<128x128xf32, #tpu.memory_space<any>> -> memref<1x128xf32, #tpu.memory_space<any>>
      %c0_i32_12 = arith.constant 0 : i32
      %13 = tpu.memref_slice %arg4[%8, %c0_i32_12] : memref<16x128xf32, #tpu.memory_space<vmem>> -> memref<1x128xf32, #tpu.memory_space<vmem>>
      tpu.enqueue_dma source(%12 : memref<1x128xf32, #tpu.memory_space<any>>) target(%13 : memref<1x128xf32, #tpu.memory_space<vmem>>) target_semaphore(%arg5 : memref<!tpu.dma_semaphore, #tpu.memory_space<semaphore_mem>>)
    }
    %c16_i32_1 = arith.constant 16 : i32
    %c0_i32_2 = arith.constant 0 : i32
    %c16_i32_3 = arith.constant 16 : i32
    %2 = arith.addi %c0_i32_2, %c16_i32_3 : i32
    %c1_i32_4 = arith.constant 1 : i32
    scf.for %arg6 = %c0_i32_2 to %2 step %c1_i32_4  : i32 {
      %c1_i32_9 = arith.constant 1 : i32
      %7 = arith.muli %arg6, %c1_i32_9 : i32
      %c0_i32_10 = arith.constant 0 : i32
      %8 = arith.addi %c0_i32_10, %7 : i32
      %c0_i32_11 = arith.constant 0 : i32
      %c0_i32_12 = arith.constant 0 : i32
      %9 = tpu.memref_slice %arg2[%c0_i32_11, %c0_i32_12] : memref<128x128xf32, #tpu.memory_space<any>> -> memref<1x128xf32, #tpu.memory_space<any>>
      %c0_i32_13 = arith.constant 0 : i32
      %10 = tpu.memref_slice %arg4[%8, %c0_i32_13] : memref<16x128xf32, #tpu.memory_space<vmem>> -> memref<1x128xf32, #tpu.memory_space<vmem>>
      tpu.wait_dma2 semaphore(%arg5 : memref<!tpu.dma_semaphore, #tpu.memory_space<semaphore_mem>>) src(%9 : memref<1x128xf32, #tpu.memory_space<any>>) dst(%10 : memref<1x128xf32, #tpu.memory_space<vmem>>)
    }
    %c16_i32_5 = arith.constant 16 : i32
    %c0 = arith.constant 0 : index
    %c0_6 = arith.constant 0 : index
    %3 = vector.load %arg4[%c0, %c0_6] : memref<16x128xf32, #tpu.memory_space<vmem>>, vector<16x128xf32>
    %cst = arith.constant 0.0883883461 : f32
    %4 = vector.broadcast %cst : f32 to vector<16x128xf32>
    %5 = arith.mulf %3, %4 : vector<16x128xf32>
    %c0_7 = arith.constant 0 : index
    %c0_8 = arith.constant 0 : index
    %6 = vector.load %arg3[%c0_7, %c0_8] : memref<16x128xf32, #tpu.memory_space<vmem>>, vector<16x128xf32>
    tpu.vector_store %arg3[%c0_7, %c0_8], %5 {strides = array<i32>} : memref<16x128xf32, #tpu.memory_space<vmem>>, vector<16x128xf32>,
    return
  }
  func.func @transform_1(%arg0: i32, %arg1: memref<16xi32, #tpu.memory_space<smem>>) -> (i32, i32) {
    %c0_i32 = arith.constant 0 : i32
    %c0_i32_0 = arith.constant 0 : i32
    return %arg0, %c0_i32 : i32, i32
  }
}

</mosaic_0001>

<bundles_post_ra>
// kernel: tpu_custom_call.1
= control target key start
LH: loop header
LB: loop body
LE: loop exit
PB: predicated region body
PF: predicated region fallthrough
CT: control target
= control target key end

     0   :  { %s179_s9 = smov [#allocation5]   ;;  %s224_s0 = inlined_call_operand.hbm [shape: s32[16], index: 0, kind: input, shape index: {}]   ;;  %s225_s1 = inlined_call_operand.hbm [shape: f32[128,128], index: 1, kind: input, shape index: {}]   ;;  %s226_s2 = inlined_call_operand.hbm [shape: f32[16,128], index: 2, kind: output, shape index: {}]  }
   0x1   :  { %8 = dma.hbm_to_smem %s224_s0, 16, %s179_s9, [#allocation4] }
   0x2   :  { %165 = dma.done.wait [#allocation4], 16 }
   0x3   :  { %166 = vsyncadd [#allocation4], 4294967280 }
   0x4   :  { %10 = sfence }
   0x5   :  { %11 = vsyncpa [#allocation7], 0  ;;  %s202_s12 = smov 0  }
   0x6 LB: > { %s20_s13 = sld [smem:[#allocation5 + %s173_s12]]  ;;  %s23_s14 = scalar_lea.vmem [#allocation2], %s173_s12  ;;  %s173_s12 = sphi %s202_s12, %s18_s12  }
   0x7   : > { %s31_s15 = sshll.u32 %s23_s14, 4  ;;  %s117_s22 = scalar_lea.hbm %s225_s1, 2048  ;;  %s32_s15 = int_to_ptr.vmem [resolvable:$true] %s31_s15 }
   0xc   : > { %s85_s16 = sshll.u32 %s20_s13, 4 }
   0xd   : > { %s22_s18 = scalar_lea.hbm %s225_s1, %s85_s16 }
   0xe   : > { %s115_s19 = scalar_lea.hbm %s22_s18, 16  ;;  %p118_p1 = scmp.lt.s32.totalorder %s22_s18, %s225_s1 }
   0xf   : > { %p116_p0 = scmp.ne.s32.totalorder %s22_s18, %s115_s19  ;;  %p119_p2 = scmp.lt.s32.totalorder %s117_s22, %s115_s19 }
  0x11   : > { %p120_p3 = por %p119_p2, %p118_p1 }
  0x13   : > { %p121_p4 = pnand %p120_p3, %p116_p0 }
  0x15   : > { %124 = shalt.err (!%p121_p4)  }
  0x16   : > { %s125_s25 = scalar_lea.vmem %s32_s15, 16  ;;  %s180_s26 = smov [#allocation2]  }
  0x17   : > { %p126_p5 = scmp.ne.s32.totalorder %s32_s15, %s125_s25  ;;  %s127_s27 = sshll.u32 %s180_s26, 4  ;;  %s128_s27 = int_to_ptr.vmem [resolvable:$false] %s127_s27 }
  0x18   : > { %s129_s28 = scalar_lea.vmem %s128_s27, 256  ;;  %p130_p6 = scmp.lt.s32.totalorder %s32_s15, %s128_s27 }
  0x19   : > { %p131_p7 = scmp.lt.s32.totalorder %s129_s28, %s125_s25 }
  0x1b   : > { %p132_p8 = por %p131_p7, %p130_p6 }
  0x1d   : > { %p133_p9 = pnand %p132_p8, %p126_p5 }
  0x1f   : > { %136 = shalt.err (!%p133_p9)  }
  0x20   : > { %34 = dma.hbm_to_vmem [thread:$0]  %s22_s18, 16, %s32_s15, [#allocation3] }
  0x21   : > { %s18_s12 = sadd.s32 1, %s173_s12  }
  0x22   : > { %p15_p10 = scmp.ge.s32.totalorder %s18_s12, 16  }
  0x23   :  { %s175_s29 = smov (%p15_p10), 0  }
  0x24   :  { %17 = sbr.rel (!%p15_p10) target bundleno = 6 (0x6), region = 40 }
  0x29 LB: > { %167 = dma.done.wait [#allocation3], 16  ;;  %s177_s29 = sphi %s175_s29, %s40_s29  }
  0x2a   : > { %168 = vsyncadd [#allocation3], 4294967280  ;;  %s40_s29 = sadd.s32 1, %s177_s29  }
  0x2b   : > { %p37_p11 = scmp.ge.s32.totalorder %s40_s29, 16  }
  0x2c   :  { %v44_v0 = vld [vmem:[#allocation2] sm:$0xff] (%p37_p11)  ;;  %v45_v1 = vld [vmem:[#allocation2 + $0x8] sm:$0xff] (%p37_p11)  ;;  %s181_s30 = smov (%p37_p11), [#allocation6]  }
  0x2d   :  { %39 = sbr.rel (!%p37_p11) target bundleno = 41 (0x29), region = 51  ;;  %v46_v2 = vmul.f32 (%p37_p11), 0.088388346, %v44_v0  ;;  %v47_v3 = vmul.f32 (%p37_p11), 0.088388346, %v45_v1  ;;  %s55_s3 = sshll.u32 (%p37_p11), %s181_s30, 4  ;;  %s56_s3 = int_to_ptr.vmem [resolvable:$true] %s55_s3 }
  0x2e   :  { %s137_s4 = scalar_lea.vmem (%p37_p11), %s56_s3, 256  ;;  %p142_p13 = scmp.lt.s32.totalorder (%p37_p11), %s56_s3, %s56_s3 }
  0x2f   :  { %48 = vst [vmem:[#allocation6] sm:$0xff] (%p37_p11), %v46_v2  ;;  %49 = vst [vmem:[#allocation6 + $0x8] sm:$0xff] (%p37_p11), %v47_v3  ;;  %p138_p12 = scmp.ne.s32.totalorder (%p37_p11), %s56_s3, %s137_s4  ;;  %p143_p0 = scmp.lt.s32.totalorder (%p37_p11), %s137_s4, %s137_s4 }
  0x31   :  { %p144_p1 = por (%p37_p11), %p143_p0, %p142_p13 }
  0x33   :  { %p145_p2 = pnand %p144_p1, %p138_p12 }
  0x35   :  { %148 = shalt.err (!%p145_p2)
}
  0x36   :  { %s182_s1 = smov 128   ;;  %s183_s5 = smov 8  }
  0x37   :  { %61 = dma.vmem_to_hbm [thread:$0]  %s56_s3, 256, %s226_s2, [#allocation7], %s182_s1, %s182_s1, %s183_s5  }
  0x38   :  { %169 = dma.done.wait [#allocation7], 256  }
  0x39   :  { %170 = vsyncadd [#allocation7], 4294967040 }
  0x3a   :  { %65 = vsyncpa [#allocation7], 1 }
  0x3b   :  { %66 = vsyncmov [#allocation3] }
  0x3e   :  { %s67_s8 = vpop.sfrf %66 }
  0x3f   :  { %p86_p3 = scmp.ne.s32.totalorder %s67_s8, 0 }
  0x41   :  { %71 = shalt.err (%p86_p3)  }

</bundles_post_ra>
